<compile_context>
chip_gen: v7x
topology: tpu7x:2x2x1
jax: 0.10.0
libtpu: 0.0.40
codegen_flags: <defaults>
</compile_context>

<pallas_src>
import jax
import jax.numpy as jnp
from jax import lax
from jax.experimental import pallas as pl
from jax.experimental.pallas import tpu as pltpu

LANE = 128  # TPU lane width — feature dims padded to a multiple of this


def _round_up(x, m):
    return ((x + m - 1) // m) * m


def _pad_to(a, shape):
    return jnp.pad(a, [(0, s - d) for d, s in zip(a.shape, shape)])


def _pick_bn(n):
    # Node rows per grid step: multiple of 8 (or the full node count when tiny),
    # capped so the (bn, Dp) vreg accumulator stays small and the node axis has
    # >= 2 balanced blocks (v7x: both TensorCores busy).
    if n <= 8:
        return n
    return max(8, min(32, _round_up(pl.cdiv(n, 2), 8)))


# ----------------------------- Pallas kernels -----------------------------

def _path_agg_kernel(row_off_ref, src_ref, dst_ref, typ_ref, hrow_ref,   # SMEM (scalar prefetch)
                     x_ref, rel_ref, q_ref, w_ref, b_ref,                # VMEM inputs
                     o_ref):                                             # VMEM output
    """One TemporalPathAgg layer, fully fused:

        agg[n]  = sum_{e : dst(e)==n} x[src(e)] * rel[type(e)]   (DistMult msg + segment-sum)
        agg[h] += query                                          (boundary condition)
        out     = relu(agg @ W + b)

    Grid = (batch, node_block).  Edges are CSR-sorted by destination, so the
    edges of a node block are the contiguous range [row_off[n0], row_off[n0+bn]).
    """
    b = pl.program_id(0)
    nb = pl.program_id(1)
    bn = o_ref.shape[0]
    dp = x_ref.shape[1]
    n0 = nb * bn
    row_iota = lax.broadcasted_iota(jnp.int32, (bn, 1), 0)

    e_lo = row_off_ref[n0]
    e_hi = row_off_ref[n0 + bn]

    def edge_body(e, acc):
        s = src_ref[e]
        t = typ_ref[e]
        d = dst_ref[e]
        # TODO(synk): edge_weight is hard-coded to ones in TRMPN.forward(); a non-unit
        # per-edge weight would be one extra SMEM-prefetched array multiplied here.
        msg = x_ref[pl.ds(s, 1), :] * rel_ref[pl.ds(t, 1), :]            # (1, dp) f32
        return acc + jnp.where(row_iota == (d - n0), msg, 0.0)

    acc = lax.fori_loop(e_lo, e_hi, edge_body, jnp.zeros((bn, dp), jnp.float32))

    # Boundary condition: add the query embedding at this batch's head node.
    # Replaces streaming a dense (B, N, D) one-hot boundary tensor from HBM.
    hr = hrow_ref[b]
    acc = acc + jnp.where(row_iota == (hr - n0), q_ref[...], 0.0)

    out = jnp.dot(acc.astype(jnp.bfloat16), w_ref[...],
                  preferred_element_type=jnp.float32)
    o_ref[...] = jnp.maximum(out + b_ref[...], 0.0)


def path_agg_layer(x, rel_emb, query, w, b, csr, h_nodes, *, bn):
    """x: (B, N, Dp) f32; rel_emb: (R, Dp) f32; query: (B, 1, Dp) f32;
    w: (Dp, Doutp) bf16; b: (1, Doutp) f32; csr = CSR-sorted edge arrays (int32);
    h_nodes: (B,) int32 head node per batch."""
    B, N, dp = x.shape
    doutp = w.shape[1]
    row_off, src_s, dst_s, typ_s = csr
    grid = (B, pl.cdiv(N, bn))

    return pl.pallas_call(
        _path_agg_kernel,
        out_shape=jax.ShapeDtypeStruct((B, N, doutp), jnp.float32),
        grid_spec=pltpu.PrefetchScalarGridSpec(
            num_scalar_prefetch=5,
            grid=grid,
            in_specs=[
                pl.BlockSpec((None, N, dp), lambda bi, i, *_: (bi, 0, 0)),        # node state (per-batch, resident)
                pl.BlockSpec((rel_emb.shape[0], dp), lambda bi, i, *_: (0, 0)),   # relation table, resident
                pl.BlockSpec((None, 1, dp), lambda bi, i, *_: (bi, 0, 0)),        # query row (boundary)
                pl.BlockSpec((dp, doutp), lambda bi, i, *_: (0, 0)),              # weights, resident
                pl.BlockSpec((1, doutp), lambda bi, i, *_: (0, 0)),               # bias
            ],
            out_specs=pl.BlockSpec((None, bn, doutp), lambda bi, i, *_: (bi, i, 0)),
        ),
        compiler_params=pltpu.CompilerParams(
            dimension_semantics=("parallel", "parallel"),
            vmem_limit_bytes=32 * 1024 * 1024,
        ),
    )(row_off, src_s, dst_s, typ_s, h_nodes, x, rel_emb, query, w, b)


def _score_kernel(x_ref, w1_ref, qb_ref, w2_ref, b2_ref, o_ref):
    # relu(feature @ W1_feat + (query @ W1_query + b1)) . w2 + b2
    h = jnp.dot(x_ref[...], w1_ref[...], preferred_element_type=jnp.float32)
    h = jnp.maximum(h + qb_ref[...], 0.0)
    # N=1 second layer: multiply-reduce on VPU/XLU instead of a degenerate matmul
    o_ref[...] = jnp.sum(h * w2_ref[...], axis=-1, keepdims=True) + b2_ref[...]


def mlp_score(feature_t, w1_feat, qb, w2, b2, *, tn):
    """feature_t: (B, Nn, Hp) bf16 (gathered tail features); qb: (B, 1, Fp) f32
    per-batch query bias (query @ W1_query + b1); returns (B, Nn) f32 scores."""
    B, Nn, hp = feature_t.shape
    fp = w1_feat.shape[1]
    grid = (B, pl.cdiv(Nn, tn))
    out = pl.pallas_call(
        _score_kernel,
        out_shape=jax.ShapeDtypeStruct((B, Nn, 1), jnp.float32),
        grid=grid,
        in_specs=[
            pl.BlockSpec((None, tn, hp), lambda bi, i: (bi, i, 0)),   # bf16 feature stream
            pl.BlockSpec((hp, fp), lambda bi, i: (0, 0)),             # W1 feature part, resident
            pl.BlockSpec((None, 1, fp), lambda bi, i: (bi, 0, 0)),    # per-batch query bias
            pl.BlockSpec((1, fp), lambda bi, i: (0, 0)),
            pl.BlockSpec((1, 1), lambda bi, i: (0, 0)),
        ],
        out_specs=pl.BlockSpec((None, tn, 1), lambda bi, i: (bi, i, 0)),
        compiler_params=pltpu.CompilerParams(
            dimension_semantics=("parallel", "parallel"),
            vmem_limit_bytes=32 * 1024 * 1024,
        ),
    )(feature_t, w1_feat, qb, w2, b2)
    return out[..., 0]


# ----------------------------- Parameters -----------------------------

def init_params(key, input_dim, hidden_dims, num_relation):
    """Deterministic synthetic parameter init (no checkpoint load).

    Feature dims are zero-padded to the 128-lane width; logical values live in
    the leading rows/cols, padding is exactly zero so padded lanes stay zero
    through every ReLU (no leak into the final reduction)."""
    num_rel2 = num_relation * 2
    dims = [input_dim] + list(hidden_dims)
    hidden_dim = hidden_dims[-1]
    feature_dim = hidden_dim + input_dim
    d_in_pad = _round_up(input_dim, LANE)
    h_pad = _round_up(hidden_dim, LANE)
    f_pad = _round_up(feature_dim, LANE)
    keys = jax.random.split(key, 4 + 2 * (len(dims) - 1))

    q = jax.random.normal(keys[0], (num_rel2, input_dim), jnp.float32) * 0.1
    w1 = jax.random.normal(keys[1], (feature_dim, feature_dim), jnp.float32) * 0.1
    w2 = jax.random.normal(keys[2], (feature_dim,), jnp.float32) * 0.1

    params = {
        "input_dim": input_dim,
        "hidden_dim": hidden_dim,
        "feature_dim": feature_dim,
        "query_emb": _pad_to(q, (num_rel2, d_in_pad)),
        # MLP layer 1 split: rows [0, hidden) multiply the node feature (MXU path),
        # rows [hidden, F) multiply the per-batch-constant query -> folded into a bias.
        "mlp_w1_feat": _pad_to(w1[:hidden_dim], (h_pad, f_pad)).astype(jnp.bfloat16),
        "mlp_w1_query": w1[hidden_dim:],                                 # (input_dim, F) f32
        "mlp_b1": jnp.zeros((feature_dim,), jnp.float32),
        "mlp_w2": _pad_to(w2.reshape(1, feature_dim), (1, f_pad)),
        "mlp_b2": jnp.zeros((1, 1), jnp.float32),
        "layers": [],
    }
    for li in range(len(dims) - 1):
        k0, k1 = keys[3 + 2 * li], keys[4 + 2 * li]
        din, dout = dims[li], dims[li + 1]
        dinp, doutp = _round_up(din, LANE), _round_up(dout, LANE)
        rel = jax.random.normal(k0, (num_rel2, din), jnp.float32) * 0.1
        W = jax.random.normal(k1, (din, dout), jnp.float32) * 0.1
        params["layers"].append({
            "rel_emb": _pad_to(rel, (num_rel2, dinp)),
            "W": _pad_to(W, (dinp, doutp)).astype(jnp.bfloat16),
            "b": jnp.zeros((1, doutp), jnp.float32),
        })
    return params


# ----------------------------- Forward (glue in JAX) -----------------------------

def trmpn_forward(params, graph, query_triple, num_relation2):
    h_index = query_triple[..., 0]
    r_index = query_triple[..., 1]
    t_index = query_triple[..., 2]
    shape = h_index.shape
    B = shape[0]
    N = graph["num_nodes"]
    input_dim = params["input_dim"]

    # negative_sample_to_tail
    is_t_neg = jnp.all(h_index == h_index[:, :1], axis=-1, keepdims=True)
    new_h = jnp.where(is_t_neg, h_index, t_index)
    new_t = jnp.where(is_t_neg, t_index, h_index)
    new_r = jnp.where(is_t_neg, r_index, r_index + num_relation2 // 2)
    h_index, t_index, r_index = new_h, new_t, new_r

    query_pad = params["query_emb"][r_index[:, 0]]                        # (B, Dinp)
    h_nodes = h_index[:, 0].astype(jnp.int32)                             # (B,)
    d_in_pad = query_pad.shape[-1]

    # CSR edge buckets by destination (index arrays only; computed once, shared
    # by every layer).
    # TODO(synk): edge_time is ignored — layers.TemporalPathAgg source is not
    # provided; this is an NBFNet-style stand-in (DistMult message, sum
    # aggregation with boundary condition, Linear + ReLU update).
    src = graph["edge_index"][0].astype(jnp.int32)
    dst = graph["edge_index"][1].astype(jnp.int32)
    etype = graph["edge_type"].astype(jnp.int32)
    E = src.shape[0]
    order = jnp.argsort(dst)
    src_s, dst_s, typ_s = src[order], dst[order], etype[order]
    counts = jnp.zeros((N,), jnp.int32).at[dst].add(1)
    row_off = jnp.concatenate(
        [jnp.zeros((1,), jnp.int32), jnp.cumsum(counts).astype(jnp.int32)])

    bn = _pick_bn(N)
    n_blocks = pl.cdiv(N, bn)
    row_off = jnp.pad(row_off, (0, n_blocks * bn + 1 - row_off.shape[0]),
                      constant_values=E)
    csr = (row_off, src_s, dst_s, typ_s)

    # Initial state (layer-0 input): query scattered at the head node.
    x = jnp.zeros((B, N, d_in_pad), jnp.float32)
    x = x.at[jnp.arange(B), h_nodes, :].add(query_pad)
    query3d = query_pad[:, None, :]                                       # (B, 1, Dinp)

    # Message-passing layers (short_cut=False): fused Pallas kernel per layer.
    for lp in params["layers"]:
        dp = lp["rel_emb"].shape[1]
        q_b = query3d
        if q_b.shape[-1] != dp:   # boundary stand-in: align padded widths
            q_b = _pad_to(q_b[..., :dp], (B, 1, dp))
        x = path_agg_layer(x, lp["rel_emb"], q_b, lp["W"], lp["b"], csr,
                           h_nodes, bn=bn)
    feature = x                                                           # (B, N, Hp)

    # Gather the candidate-tail rows first (small), stream them to the scoring
    # kernel in bf16.  Equivalent to the reference concat-then-gather (query is
    # constant across nodes), without materializing (B, N, F) or padding.
    Nn = t_index.shape[1]
    hp = feature.shape[-1]
    idx = jnp.broadcast_to(t_index[..., None], (B, Nn, hp)).astype(jnp.int32)
    feature_t = jnp.take_along_axis(feature, idx, axis=1).astype(jnp.bfloat16)

    f_pad = params["mlp_w1_feat"].shape[1]
    qb = query_pad[:, :input_dim] @ params["mlp_w1_query"] + params["mlp_b1"]  # (B, F)
    qb = _pad_to(qb, (B, f_pad))[:, None, :]                                   # (B, 1, Fp)

    tn = Nn if Nn <= 256 else 256
    score = mlp_score(feature_t, params["mlp_w1_feat"], qb,
                      params["mlp_w2"], params["mlp_b2"], tn=tn)               # (B, Nn)
    return score.reshape(shape)


# ----------------------------- Example run -----------------------------

if __name__ == "__main__":
    key = jax.random.PRNGKey(0)
    k_par, k_edge, k_rel, k_time, k_h, k_r, k_t = jax.random.split(key, 7)

    # small shapes
    input_dim = 32
    hidden_dims = [32, 32]
    num_nodes = 16
    num_relation = 3            # -> num_relation2 = 6
    num_relation2 = num_relation * 2
    batch_size = 2
    num_neg_plus1 = 4
    num_edges = 24

    params = init_params(k_par, input_dim, hidden_dims, num_relation)

    graph = {
        "num_nodes": num_nodes,
        "edge_index": jax.random.randint(k_edge, (2, num_edges), 0, num_nodes, jnp.int32),
        "edge_type": jax.random.randint(k_rel, (num_edges,), 0, num_relation2, jnp.int32),
        "edge_time": jax.random.randint(k_time, (num_edges,), 0, 10, jnp.int32),
    }

    # query triples: head & relation constant along the negative axis,
    # column 0 is the positive tail, the rest are corrupted tails.
    h = jax.random.randint(k_h, (batch_size, 1), 0, num_nodes, jnp.int32)
    r = jax.random.randint(k_r, (batch_size, 1), 0, num_relation, jnp.int32)
    t = jax.random.randint(k_t, (batch_size, num_neg_plus1), 0, num_nodes, jnp.int32)
    h = jnp.broadcast_to(h, (batch_size, num_neg_plus1))
    r = jnp.broadcast_to(r, (batch_size, num_neg_plus1))
    query_triple = jnp.stack([h, r, t], axis=-1)                          # (2, 4, 3)

    score = trmpn_forward(params, graph, query_triple, num_relation2)
    jax.block_until_ready(score)
    assert score.shape == (batch_size, num_neg_plus1)
    assert bool(jnp.all(jnp.isfinite(score)))
    print("KERNEL_OK")
</pallas_src>

<mosaic_0001>
module attributes {stable_mosaic.version = 11 : i64} {
  func.func @_path_agg_kernel(%arg0: i32, %arg1: i32, %arg2: memref<17xi32, #tpu.memory_space<smem>>, %arg3: memref<24xi32, #tpu.memory_space<smem>>, %arg4: memref<24xi32, #tpu.memory_space<smem>>, %arg5: memref<24xi32, #tpu.memory_space<smem>>, %arg6: memref<2xi32, #tpu.memory_space<smem>>, %arg7: memref<1x16x128xf32, #tpu.memory_space<vmem>>, %arg8: memref<6x128xf32, #tpu.memory_space<vmem>>, %arg9: memref<1x1x128xf32, #tpu.memory_space<vmem>>, %arg10: memref<128x128xbf16, #tpu.memory_space<vmem>>, %arg11: memref<1x128xf32, #tpu.memory_space<vmem>>, %arg12: memref<1x8x128xf32, #tpu.memory_space<vmem>>) attributes {dimension_semantics = [#tpu.dimension_semantics<parallel>, #tpu.dimension_semantics<parallel>], iteration_bounds = array<i64: 2, 2>, scalar_prefetch = 5 : i64, scratch_operands = 0 : i64, tpu.core_type = #tpu.core_type<tc>, window_params = [{transform_indices = @transform_0, window_bounds = array<i64: 1, 16, 128>}, {pipeline_mode = #tpu.pipeline_mode<synchronous>, transform_indices = @transform_1, window_bounds = array<i64: 6, 128>}, {transform_indices = @transform_2, window_bounds = array<i64: 1, 1, 128>}, {pipeline_mode = #tpu.pipeline_mode<synchronous>, transform_indices = @transform_3, window_bounds = array<i64: 128, 128>}, {pipeline_mode = #tpu.pipeline_mode<synchronous>, transform_indices = @transform_4, window_bounds = array<i64: 1, 128>}, {transform_indices = @transform_5, window_bounds = array<i64: 1, 8, 128>}]} {
    %c8_i32 = arith.constant 8 : i32
    %0 = arith.muli %arg1, %c8_i32 : i32
    %1 = tpu.iota {dimensions = array<i32: 0>} : vector<8x1xi32>
    %2 = arith.index_cast %0 : i32 to index
    %3 = memref.load %arg2[%2] : memref<17xi32, #tpu.memory_space<smem>>
    %c8_i32_0 = arith.constant 8 : i32
    %4 = arith.addi %0, %c8_i32_0 : i32
    %5 = arith.index_cast %4 : i32 to index
    %6 = memref.load %arg2[%5] : memref<17xi32, #tpu.memory_space<smem>>
    %cst = arith.constant 0.000000e+00 : f32
    %7 = vector.broadcast %cst : f32 to vector<8x128xf32>
    %8 = arith.subi %6, %3 : i32
    %9 = arith.addi %3, %8 : i32
    %c1_i32 = arith.constant 1 : i32
    %10 = scf.for %arg13 = %3 to %9 step %c1_i32 iter_args(%arg14 = %7) -> (vector<8x128xf32>)  : i32 {
      %36 = arith.index_cast %arg13 : i32 to index
      %37 = memref.load %arg3[%36] : memref<24xi32, #tpu.memory_space<smem>>
      %38 = arith.index_cast %arg13 : i32 to index
      %39 = memref.load %arg5[%38] : memref<24xi32, #tpu.memory_space<smem>>
      %40 = arith.index_cast %arg13 : i32 to index
      %41 = memref.load %arg4[%40] : memref<24xi32, #tpu.memory_space<smem>>
      %c0_13 = arith.constant 0 : index
      %42 = arith.index_cast %37 : i32 to index
      %c0_14 = arith.constant 0 : index
      %43 = vector.load %arg7[%c0_13, %42, %c0_14] : memref<1x16x128xf32, #tpu.memory_space<vmem>>, vector<1x1x128xf32>
      %44 = vector.shape_cast %43 : vector<1x1x128xf32> to vector<1x128xf32>
      %45 = arith.index_cast %39 : i32 to index
      %c0_15 = arith.constant 0 : index
      %46 = vector.load %arg8[%45, %c0_15] : memref<6x128xf32, #tpu.memory_space<vmem>>, vector<1x128xf32>
      %47 = arith.mulf %44, %46 : vector<1x128xf32>
      %48 = arith.subi %41, %0 : i32
      %49 = vector.broadcast %48 : i32 to vector<8x1xi32>
      %50 = arith.cmpi eq, %1, %49 : vector<8x1xi32>
      %cst_16 = arith.constant 0.000000e+00 : f32
      %51 = vector.shape_cast %50 : vector<8x1xi1> to vector<8x1xi1>
      %52 = vector.broadcast %51 : vector<8x1xi1> to vector<8x128xi1>
      %53 = vector.shape_cast %47 : vector<1x128xf32> to vector<1x128xf32>
      %54 = vector.broadcast %53 : vector<1x128xf32> to vector<8x128xf32>
      %55 = vector.broadcast %cst_16 : f32 to vector<8x128xf32>
      %56 = arith.select %52, %54, %55 : vector<8x128xi1>, vector<8x128xf32>
      %57 = arith.addf %arg14, %56 : vector<8x128xf32>
      scf.yield %57 : vector<8x128xf32>
    }
    %11 = arith.index_cast %arg0 : i32 to index
    %12 = memref.load %arg6[%11] : memref<2xi32, #tpu.memory_space<smem>>
    %13 = arith.subi %12, %0 : i32
    %14 = vector.broadcast %13 : i32 to vector<8x1xi32>
    %15 = arith.cmpi eq, %1, %14 : vector<8x1xi32>
    %c0 = arith.constant 0 : index
    %c0_1 = arith.constant 0 : index
    %c0_2 = arith.constant 0 : index
    %16 = vector.load %arg9[%c0, %c0_1, %c0_2] : memref<1x1x128xf32, #tpu.memory_space<vmem>>, vector<1x1x128xf32>
    %17 = vector.shape_cast %16 : vector<1x1x128xf32> to vector<1x128xf32>
    %cst_3 = arith.constant 0.000000e+00 : f32
    %18 = vector.shape_cast %15 : vector<8x1xi1> to vector<8x1xi1>
    %19 = vector.broadcast %18 : vector<8x1xi1> to vector<8x128xi1>
    %20 = vector.shape_cast %17 : vector<1x128xf32> to vector<1x128xf32>
    %21 = vector.broadcast %20 : vector<1x128xf32> to vector<8x128xf32>
    %22 = vector.broadcast %cst_3 : f32 to vector<8x128xf32>
    %23 = arith.select %19, %21, %22 : vector<8x128xi1>, vector<8x128xf32>
    %24 = arith.addf %10, %23 : vector<8x128xf32>
    %25 = arith.truncf %24 : vector<8x128xf32> to vector<8x128xbf16>
    %c0_4 = arith.constant 0 : index
    %c0_5 = arith.constant 0 : index
    %26 = vector.load %arg10[%c0_4, %c0_5] : memref<128x128xbf16, #tpu.memory_space<vmem>>, vector<128x128xbf16>
    %cst_6 = arith.constant dense<0.000000e+00> : vector<8x128xf32>
    %27 = tpu.matmul %25, %26, %cst_6 {dimension_numbers = #tpu.dot_dimension_numbers<[1], [0], [0], [1], [0, 0, 1, 1], [], []>} : vector<8x128xbf16>, vector<128x128xbf16>, vector<8x128xf32> -> vector<8x128xf32>
    %c0_7 = arith.constant 0 : index
    %c0_8 = arith.constant 0 : index
    %28 = vector.load %arg11[%c0_7, %c0_8] : memref<1x128xf32, #tpu.memory_space<vmem>>, vector<1x128xf32>
    %29 = vector.broadcast %28 : vector<1x128xf32> to vector<8x128xf32>
    %30 = arith.addf %27, %29 : vector<8x128xf32>
    %cst_9 = arith.constant 0.000000e+00 : f32
    %31 = vector.broadcast %cst_9 : f32 to vector<8x128xf32>
    %32 = arith.maximumf %30, %31 : vector<8x128xf32>
    %c0_10 = arith.constant 0 : index
    %c0_11 = arith.constant 0 : index
    %c0_12 = arith.constant 0 : index
    %33 = vector.load %arg12[%c0_10, %c0_11, %c0_12] : memref<1x8x128xf32, #tpu.memory_space<vmem>>, vector<1x8x128xf32>
    %34 = vector.shape_cast %33 : vector<1x8x128xf32> to vector<8x128xf32>
    %35 = vector.shape_cast %32 : vector<8x128xf32> to vector<1x8x128xf32>
    tpu.vector_store %arg12[%c0_10, %c0_11, %c0_12], %35 {strides = array<i32>} : memref<1x8x128xf32, #tpu.memory_space<vmem>>, vector<1x8x128xf32>,
    return
  }
  func.func @transform_0(%arg0: i32, %arg1: i32, %arg2: memref<17xi32, #tpu.memory_space<smem>>, %arg3: memref<24xi32, #tpu.memory_space<smem>>, %arg4: memref<24xi32, #tpu.memory_space<smem>>, %arg5: memref<24xi32, #tpu.memory_space<smem>>, %arg6: memref<2xi32, #tpu.memory_space<smem>>) -> (i32, i32, i32) {
    %c0_i32 = arith.constant 0 : i32
    %c0_i32_0 = arith.constant 0 : i32
    %c0_i32_1 = arith.constant 0 : i32
    return %arg0, %c0_i32, %c0_i32_0 : i32, i32, i32
  }
  func.func @transform_1(%arg0: i32, %arg1: i32, %arg2: memref<17xi32, #tpu.memory_space<smem>>, %arg3: memref<24xi32, #tpu.memory_space<smem>>, %arg4: memref<24xi32, #tpu.memory_space<smem>>, %arg5: memref<24xi32, #tpu.memory_space<smem>>, %arg6: memref<2xi32, #tpu.memory_space<smem>>) -> (i32, i32) {
    %c0_i32 = arith.constant 0 : i32
    %c0_i32_0 = arith.constant 0 : i32
    %c0_i32_1 = arith.constant 0 : i32
    return %c0_i32, %c0_i32_0 : i32, i32
  }
  func.func @transform_2(%arg0: i32, %arg1: i32, %arg2: memref<17xi32, #tpu.memory_space<smem>>, %arg3: memref<24xi32, #tpu.memory_space<smem>>, %arg4: memref<24xi32, #tpu.memory_space<smem>>, %arg5: memref<24xi32, #tpu.memory_space<smem>>, %arg6: memref<2xi32, #tpu.memory_space<smem>>) -> (i32, i32, i32) {
    %c0_i32 = arith.constant 0 : i32
    %c0_i32_0 = arith.constant 0 : i32
    %c0_i32_1 = arith.constant 0 : i32
    return %arg0, %c0_i32, %c0_i32_0 : i32, i32, i32
  }
  func.func @transform_3(%arg0: i32, %arg1: i32, %arg2: memref<17xi32, #tpu.memory_space<smem>>, %arg3: memref<24xi32, #tpu.memory_space<smem>>, %arg4: memref<24xi32, #tpu.memory_space<smem>>, %arg5: memref<24xi32, #tpu.memory_space<smem>>, %arg6: memref<2xi32, #tpu.memory_space<smem>>) -> (i32, i32) {
    %c0_i32 = arith.constant 0 : i32
    %c0_i32_0 = arith.constant 0 : i32
    %c0_i32_1 = arith.constant 0 : i32
    return %c0_i32, %c0_i32_0 : i32, i32
  }
  func.func @transform_4(%arg0: i32, %arg1: i32, %arg2: memref<17xi32, #tpu.memory_space<smem>>, %arg3: memref<24xi32, #tpu.memory_space<smem>>, %arg4: memref<24xi32, #tpu.memory_space<smem>>, %arg5: memref<24xi32, #tpu.memory_space<smem>>, %arg6: memref<2xi32, #tpu.memory_space<smem>>) -> (i32, i32) {
    %c0_i32 = arith.constant 0 : i32
    %c0_i32_0 = arith.constant 0 : i32
    %c0_i32_1 = arith.constant 0 : i32
    return %c0_i32, %c0_i32_0 : i32, i32
  }
  func.func @transform_5(%arg0: i32, %arg1: i32, %arg2: memref<17xi32, #tpu.memory_space<smem>>, %arg3: memref<24xi32, #tpu.memory_space<smem>>, %arg4: memref<24xi32, #tpu.memory_space<smem>>, %arg5: memref<24xi32, #tpu.memory_space<smem>>, %arg6: memref<2xi32, #tpu.memory_space<smem>>) -> (i32, i32, i32) {
    %c0_i32 = arith.constant 0 : i32
    %c0_i32_0 = arith.constant 0 : i32
    return %arg0, %arg1, %c0_i32 : i32, i32, i32
  }
}

</mosaic_0001>

<bundles_post_ra>
// kernel: tpu_custom_call.1
= control target key start
LH: loop header
LB: loop body
LE: loop exit
PB: predicated region body
PF: predicated region fallthrough
CT: control target
= control target key end

     0   :  { %s1491_s0 = inlined_call_operand.hbm [shape: s32[17], index: 0, kind: input, shape index: {}]   ;;  %s1492_s5 = inlined_call_operand.hbm [shape: f32[2,16,128], index: 5, kind: input, shape index: {}]   ;;  %s1493_s6 = inlined_call_operand.vmem [shape: f32[6,128], index: 6, kind: input, shape index: {}]   ;;  %s1494_s7 = inlined_call_operand.vmem [shape: f32[2,1,128], index: 7, kind: input, shape index: {}]   ;;  %s1495_s8 = inlined_call_operand.hbm [shape: bf16[128,128], index: 8, kind: input, shape index: {}]   ;;  %s1496_s9 = inlined_call_operand.vmem [shape: f32[1,128], index: 9, kind: input, shape index: {}]   ;;  %s1497_s10 = inlined_call_operand.hbm [shape: f32[2,16,128], index: 10, kind: output, shape index: {}]   ;;  %s1498_s1 = inlined_call_operand.vmem [shape: s32[24], index: 1, kind: input, shape index: {}]   ;;  %s1499_s2 = inlined_call_operand.vmem [shape: s32[24], index: 2, kind: input, shape index: {}]   ;;  %s1500_s3 = inlined_call_operand.vmem [shape: s32[24], index: 3, kind: input, shape index: {}]   ;;  %s1501_s4 = inlined_call_operand.vmem [shape: s32[2], index: 4, kind: input, shape index: {}]  }
   0x1   :  { %1516 = sst [smem:[#allocation24_spill]] %s1495_s8  ;;  %s815_s15 = scalar_lea.hbm %s1491_s0, 16 }
   0x2   :  { %1517 = sst [smem:[#allocation25_spill]] %s1497_s10  ;;  %p816_p0 = scmp.ne.s32.totalorder %s1491_s0, %s815_s15 }
   0x3   :  { %p819_p1 = scmp.lt.u32.totalorder %s815_s15, %s1491_s0 }
   0x5   :  { %p821_p2 = pnand %p819_p1, %p816_p0 }
   0x7   :  { %824 = shalt.err (!%p821_p2)  }
   0x8   :  { %s1085_s20 = smov [#allocation3]   ;;  %s17_s25 = sshll.u32 %s1498_s1, 4  ;;  %s18_s25 = int_to_ptr.vmem [resolvable:$true] %s17_s25 }
   0x9   :  { %16 = dma.hbm_to_smem %s1491_s0, 16, %s1085_s20, [#allocation2] }
   0xa   :  { %s21_s28 = sshll.u32 %s1499_s2, 4  ;;  %s825_s29 = scalar_lea.vmem %s18_s25, 16  ;;  %s22_s28 = int_to_ptr.vmem [resolvable:$true] %s21_s28 }
   0xb   :  { %p826_p3 = scmp.ne.s32.totalorder %s18_s25, %s825_s29  ;;  %p830_p4 = scmp.lt.s32.totalorder %s18_s25, %s18_s25 }
   0xc   :  { %p831_p5 = scmp.lt.s32.totalorder %s825_s29, %s825_s29 }
   0xe   :  { %p832_p6 = por %p831_p5, %p830_p4 }
  0x10   :  { %p833_p7 = pnand %p832_p6, %p826_p3 }
  0x12   :  { %836 = shalt.err (!%p833_p7)  }
  0x13   :  { %s1086_s30 = smov [#allocation4]   ;;  %s25_s12 = sshll.u32 %s1500_s3, 4  ;;  %s26_s12 = int_to_ptr.vmem [resolvable:$true] %s25_s12 }
  0x14   :  { %20 = dma.vmem_to_smem %s18_s25, 16, %s1086_s30, [#allocation2] }
  0x15   :  { %s837_s1 = scalar_lea.vmem %s22_s28, 16  ;;  %p842_p9 = scmp.lt.s32.totalorder %s22_s28, %s22_s28 }
  0x16   :  { %p838_p8 = scmp.ne.s32.totalorder %s22_s28, %s837_s1  ;;  %p843_p10 = scmp.lt.s32.totalorder %s837_s1, %s837_s1 }
  0x18   :  { %p844_p11 = por %p843_p10, %p842_p9 }
  0x1a   :  { %p845_p12 = pnand %p844_p11, %p838_p8 }
  0x1c   :  { %848 = shalt.err (!%p845_p12)  }
  0x1d   :  { %s1087_s2 = smov [#allocation5]   ;;  %s849_s13 = scalar_lea.vmem %s26_s12, 16 }
  0x1e   :  { %24 = dma.vmem_to_smem %s22_s28, 16, %s1087_s2, [#allocation2] }
  0x1f   :  { %p850_p13 = scmp.ne.s32.totalorder %s26_s12, %s849_s13  ;;  %p854_p0 = scmp.lt.s32.totalorder %s26_s12, %s26_s12 }
  0x20   :  { %p855_p1 = scmp.lt.s32.totalorder %s849_s13, %s849_s13 }
  0x22   :  { %p856_p2 = por %p855_p1, %p854_p0 }
  0x24   :  { %p857_p3 = pnand %p856_p2, %p850_p13 }
  0x26   :  { %860 = shalt.err (!%p857_p3)  }
  0x27   :  { %s1088_s14 = smov [#allocation6]   ;;  %s29_s16 = sshll.u32 %s1501_s4, 4  ;;  %s30_s16 = int_to_ptr.vmem [resolvable:$true] %s29_s16 }
  0x28   :  { %28 = dma.vmem_to_smem %s26_s12, 16, %s1088_s14, [#allocation2] }
  0x29   :  { %s861_s17 = scalar_lea.vmem %s30_s16, 16  ;;  %p866_p5 = scmp.lt.s32.totalorder %s30_s16, %s30_s16 }
  0x2a   :  { %p862_p4 = scmp.ne.s32.totalorder %s30_s16, %s861_s17  ;;  %p867_p6 = scmp.lt.s32.totalorder %s861_s17, %s861_s17 }
  0x2c   :  { %p868_p7 = por %p867_p6, %p866_p5 }
  0x2e   :  { %p869_p8 = pnand %p868_p7, %p862_p4 }
  0x30   :  { %872 = shalt.err (!%p869_p8)  }
  0x31   :  { %s1089_s18 = smov [#allocation7]  }
  0x32   :  { %32 = dma.vmem_to_smem %s30_s16, 16, %s1089_s18, [#allocation2] }
  0x33   :  { %1015 = dma.done.wait [#allocation2], 80 }
  0x34   :  { %1016 = vsyncadd [#allocation2], 4294967216 }
  0x35   :  { %34 = sfence }
  0x36   :  { %35 = vsyncpa [#allocation9], 0 }
  0x37   :  { %37 = vsyncpa [#allocation9 + $0x1], 0 }
  0x38   :  { %38 = vsyncpa [#allocation12], 0 }
  0x39   :  { %39 = vsyncpa [#allocation10], 0 }
  0x3a   :  { %41 = vsyncpa [#allocation10 + $0x1], 0  ;;  %s1178_s19 = smov 0   ;;  %s1180_s4 = smov 0  }
  0x3b   :  { %s1182_s20 = smov 0   ;;  %s1184_s21 = smov 0  }
  0x3c   :  { %s1186_s22 = smov 0   ;;  %s1188_s23 = smov 0  }
  0x3d   :  { %s1190_s24 = smov 0   ;;  %s1192_s25 = smov 0  }
  0x3e   :  { %s1194_s26 = smov 0   ;;  %s1196_s27 = smov 0  }
  0x3f   :  { %s1198_s28 = smov 0  }
  0x40 LB: > { %1518 = sst [smem:[#allocation18_spill]] %s1031_s19  ;;  %s601_s29 = sadd.s32 4294967295, %s1071_s28   ;;  %s1071_s28 = sphi %s1198_s28, %s47_s28   ;;  %s1067_s27 = sphi %s1196_s27, %s1555_s27   ;;  %s1063_s26 = sphi %s1194_s26, %s1554_s26   ;;  %s1059_s25 = sphi %s1192_s25, %s1553_s25   ;;  %s1055_s24 = sphi %s1190_s24, %s1544_s24   ;;  %s1051_s23 = sphi %s1188_s23, %s1552_s23   ;;  %s1047_s22 = sphi %s1186_s22, %s1551_s22   ;;  %s1043_s21 = sphi %s1184_s21, %s1550_s21   ;;  %s1039_s20 = sphi %s1182_s20, %s1549_s20   ;;  %s1035_s4 = sphi %s1180_s4, %s1548_s4   ;;  %s1031_s19 = sphi %s1178_s19, %s1547_s19  }
  0x41   : > { %1519 = sst [smem:[#allocation19_spill]] %s1063_s26  ;;  %s602_s30 = sadd.s32 4294967294, %s1071_s28  }
  0x42   : > { %p79_p9 = scmp.ne.s32.totalorder %s1047_s22, %s1043_s21  ;;  %p1234_p10 = scmp.eq.s32.totalorder %s601_s29, 0 }
  0x43   : > { %p193_p11 = scmp.ne.s32.totalorder %s1039_s20, %s1035_s4  ;;  %p194_p13 = scmp.eq.s32.totalorder %s601_s29, 3 }
  0x44   : > { %s1520_s0 = scalar_select %p1234_p10, 1, 0 }
  0x45   : > { %p1243_p12 = por %p1234_p10, %p79_p9  ;;  %p199_p0 = scmp.ne.s32.totalorder %s1035_s4, %s1031_s19 }
  0x46   : > { %p200_p1 = scmp.eq.s32.totalorder %s602_s30, 3  ;;  %p1249_p2 = por %p194_p13, %p193_p11 }
  0x47   : > { %s1521_s12 = scalar_select %p1243_p12, 1, 0 }
  0x48   : > { %s1522_s1 = scalar_select %p1249_p2, 1, 0 }
  0x49   : > { %p603_p3 = scmp.ge.s32.totalorder %s1071_s28, 1  ;;  %p1254_p4 = por %p200_p1, %p199_p0 }
  0x4a   : > { %1523 = sst [smem:[#allocation20_spill]] %s1522_s1  ;;  %p207_p5 = scmp.lt.s32.totalorder %s1071_s28, 5 }
  0x4b   : > { %s1524_s2 = scalar_select %p1254_p4, 1, 0 }
  0x4c   : > { %p1259_p6 = pnand %p603_p3, %p207_p5  ;;  %s1090_s14 = smov [#allocation11]  }
  0x4d   : > { %1525 = sst [smem:[#allocation21_spill]] %s1524_s2  ;;  %s222_s3 = sshll.u32 %s1090_s14, 4  ;;  %s223_s3 = int_to_ptr.vmem [resolvable:$true] %s222_s3 }
  0x4e   : > { %s1526_s13 = scalar_select %p1259_p6, 1, 0 }
  0x4f   : > { %p667_p7 = pneg %p1259_p6  ;;  %s1528_s8 = sld [smem:[#allocation24_spill]] }
  0x51   : > { %p1267_p8 = pnand %p667_p7, %p1234_p10 }
  0x53   : > { %p875_p11 = pneg %p1267_p8 }
  0x55   : > { %s873_s18 = scalar_lea.hbm %s1528_s8, 1024 }
  0x56   : > { %p874_p9 = scmp.ne.s32.totalorder %s1528_s8, %s873_s18  ;;  %p880_p1 = scmp.lt.u32.totalorder %s873_s18, %s1528_s8 }
  0x58   : > { %p876_p13 = pnand %p875_p11, %p874_p9 }
  0x5a   : > { %p877_p0 = pneg %p876_p13 }
  0x5c   : > { %p882_p3 = pnand %p880_p1, %p877_p0 }
  0x5e   : > { %885 = shalt.err (!%p882_p3)
}
  0x5f   : > { %s886_s11 = scalar_lea.vmem %s223_s3, 1024  ;;  %p894_p2 = scmp.lt.s32.totalorder %s223_s3, %s223_s3 }
  0x60   : > { %p887_p5 = scmp.ne.s32.totalorder %s223_s3, %s886_s11  ;;  %p895_p10 = scmp.lt.s32.totalorder %s886_s11, %s886_s11 }
  0x62   : > { %p889_p7 = pnand %p887_p5, %p875_p11  ;;  %p896_p12 = por %p895_p10, %p894_p2 }
  0x64   : > { %p890_p4 = pneg %p889_p7 }
  0x66   : > { %p897_p6 = pnand %p896_p12, %p890_p4 }
  0x68   : > { %900 = shalt.err (!%p897_p6)
}
  0x69   : > { %s1091_s16 = smov 64   ;;  %s1092_s17 = smov 4  }
  0x6a   : > { %670 = dma.hbm_to_vmem [thread:$0]  (!%p1267_p8), %s1528_s8, 1024, %s223_s3, [#allocation12], %s1091_s16, %s1091_s16, %s1092_s17  }
  0x6b   : > { %s56_s11 = sadd.s32 1, %s1063_s26  ;;  %s59_s29 = sadd.s32 1, %s1067_s27 }
  0x6c   : > { %p57_p10 = scmp.ge.s32.totalorder %s56_s11, 2  ;;  %s66_s30 = sadd.s32 1, %s1051_s23 }
  0x6d   : > { %p73_p12 = scmp.ne.s32.totalorder %s1051_s23, %s1047_s22  ;;  %p74_p2 = scmp.eq.s32.totalorder %s1071_s28, 0 }
  0x6e   : > { %s1557_s11 = smov (%p57_p10, %s56_s11), 0  ;;  %s1559_s29 = smov (!%p57_p10, %s59_s29), %s1067_s27 }
  0x6f   : > { %1529 = sst [smem:[#allocation22_spill]] %s1557_s11  ;;  %s179_s15 = ssub.s32 %s1063_s26, %s1557_s11 }
  0x70   : > { %p61_p4 = scmp.ge.s32.totalorder %s1559_s29, 2  ;;  %p680_p6 = scmp.lt.s32.totalorder %s1071_s28, 4 }
  0x71   : > { %p1299_p8 = por %p74_p2, %p73_p12  ;;  %s239_s14 = sand.u32 1, %s1051_s23  }
  0x72   : > { %s1561_s29 = smov (%p61_p4, %s1559_s29), 0  ;;  %s606_s16 = sshll.u32 %s239_s14, 4 }
  0x73   : > { %1531 = sst [smem:[#allocation23_spill]] %s1561_s29  ;;  %s63_s17 = ssub.s32 %s1067_s27, %s1561_s29 }
  0x74   : > { %p64_p9 = scmp.eq.s32.totalorder %s63_s17, 0  ;;  %s180_s18 = sor.u32 %s179_s15, %s63_s17 }
  0x75   : > { %p181_p11 = scmp.eq.s32.totalorder %s180_s18, 0  ;;  %s629_s21 = sshll.u32 %s1067_s27, 8 }
  0x76   : > { %s1310_s8 = scalar_select %p64_p9, %s1051_s23, %s66_s30  }
  0x77   : > { %s1532_s11 = sadd.s32 1, %s1039_s20  ;;  %s1320_s10 = scalar_lea.hbm %s1492_s5, %s629_s21 }
  0x78   : > { %s1315_s26 = scalar_select %p181_p11, %s1039_s20, %s1532_s11  }
  0x79   : > { %s243_s1 = scalar_lea.vmem [#allocation8], %s606_s16  ;;  %p1328_p13 = pnand %p680_p6, %p1299_p8 }
  0x7a   : > { %s250_s29 = sshll.u32 %s243_s1, 4  ;;  %s1332_s11 = scalar_lea.sflag [#allocation9], %s239_s14  ;;  %s1322_s29 = int_to_ptr.vmem [resolvable:$true] %s250_s29 }
  0x7b   : > { %s901_s19 = scalar_lea.hbm %s1320_s10, 256  ;;  %p903_p1 = pneg %p1328_p13 }
  0x7c   : > { %p902_p0 = scmp.ne.s32.totalorder %s1320_s10, %s901_s19  ;;  %s906_s15 = scalar_lea.hbm %s1492_s5, 512 }
  0x7d   : > { %p907_p7 = scmp.lt.u32.totalorder %s1320_s10, %s1492_s5  ;;  %p908_p10 = scmp.lt.u32.totalorder %s906_s15, %s901_s19 }
  0x7e   : > { %p904_p3 = pnand %p903_p1, %p902_p0  ;;  %p910_p2 = scmp.lt.u32.totalorder %s901_s19, %s1320_s10 }
  0x7f   : > { %p909_p12 = por %p908_p10, %p907_p7 }
  0x80   : > { %p905_p5 = pneg %p904_p3 }
  0x81   : > { %p911_p4 = por %p910_p2, %p909_p12 }
  0x83   : > { %p912_p6 = pnand %p911_p4, %p905_p5 }
  0x85   : > { %915 = shalt.err (!%p912_p6)
}
  0x86   : > { %s916_s14 = scalar_lea.vmem %s1322_s29, 256  ;;  %s1093_s17 = smov [#allocation8]  }
  0x87   : > { %p917_p8 = scmp.ne.s32.totalorder %s1322_s29, %s916_s14  ;;  %s921_s18 = sshll.u32 %s1093_s17, 4  ;;  %s922_s18 = int_to_ptr.vmem [resolvable:$false] %s921_s18 }
  0x88   : > { %s923_s21 = scalar_lea.vmem %s922_s18, 512  ;;  %p924_p0 = scmp.lt.s32.totalorder %s1322_s29, %s922_s18 }
  0x89   : > { %p919_p9 = pnand %p917_p8, %p903_p1  ;;  %p925_p3 = scmp.lt.s32.totalorder %s923_s21, %s916_s14 }
  0x8b   : > { %p920_p11 = pneg %p919_p9  ;;  %p926_p7 = por %p925_p3, %p924_p0 }
  0x8d   : > { %p927_p10 = pnand %p926_p7, %p920_p11 }
  0x8f   : > { %930 = shalt.err (!%p927_p10)
}
  0x90   : > { %s1094_s19 = smov 128   ;;  %s1095_s1 = smov 8  }
  0x91   : > { %674 = dma.hbm_to_vmem [thread:$0]  (!%p1328_p13), %s1320_s10, 256, %s1322_s29, %s1332_s11, %s1094_s19, %s1094_s19, %s1095_s1  }
  0x92   : > { %p1534_p1 = scmp.ne.s32.totalorder %s1526_s13, 0 }
  0x93   : > { %s270_s2 = sand.u32 (!%p1534_p1), 1, %s1047_s22   ;;  %p1535_p5 = scmp.ne.s32.totalorder (!%p1534_p1), %s1521_s12, 0 }
  0x94   : > { %268 = sbr.rel (%p1534_p1) target bundleno = 456 (0x1c8), region = 40  ;;  %s1363_s15 = sshll.u32 (!%p1534_p1), %s270_s2, 4 }
  0x95   : > { %s271_s3 = scalar_lea.sflag (!%p1534_p1), [#allocation9], %s270_s2  ;;  %s274_s16 = scalar_lea.vmem (!%p1534_p1), [#allocation8], %s1363_s15 }
  0x9b   : > { %1018 = dma.done.wait (%p1535_p5), %s271_s3, 256  }
  0x9c   : > { %1020 = vsyncadd (%p1535_p5), %s271_s3, 4294967040  ;;  %p1536_p12 = scmp.ne.s32.totalorder %s1520_s0, 0 }
  0x9e   : > { %1022 = dma.done.wait (%p1536_p12), [#allocation12], 1024  }
  0x9f   : > { %1024 = vsyncadd (%p1536_p12), [#allocation12], 4294966272  ;;  %s1375_s10 = sshll.u32 %s1055_s24, 3  ;;  %s1515_s13 = sand.u32 1, %s1035_s4   ;;  %v313_v0 = vlaneseq  ;;  %v1081_v2 = vmov 0.0  }
  0xa0   : > { %s315_s29 = sld [smem:[#allocation3 + %s1375_s10]]   ;;  %s316_s12 = sadd.s32 8, %s1375_s10 }
  0xa1   : > { %s1380_s30 = sld [smem:[#allocation3 + %s316_s12]]  ;;  %s1384_s11 = sshll.u32 %s1515_s13, 3  ;;  %v1386_v1 = vshrl.u32 %v313_v0, 7 }
  0xa2   : > { %p308_p13 = scmp.lt.s32.totalorder %s1059_s25, 1  ;;  %s307_s21 = scalar_lea.vmem [#allocation13], %s1384_s11 }
  0xa4   : > { %s1390_s0 = scalar_select %p308_p13, %s1059_s25, 1 }
  0xa6   : > { %s310_s18 = scalar_lea.vmem %s1494_s7, %s1390_s0 }
  0xa7   : > { %p544_p2 = scmp.ge.s32.totalorder %s315_s29, %s1380_s30 }
  0xa8   : > { %v1073_v3 = vmov (!%p544_p2), 0.0   ;;  %s1077_s19 = smov (!%p544_p2), %s315_s29  }
  0xa9   : > { %546 = sbr.rel (%p544_p2) target bundleno = 193 (0xc1), region = 95 }
  0xb0 LB: >> { %s325_s1 = sld [smem:[#allocation4 + %s1079_s19]]  ;;  %v340_v4 = vsub.s32 0, %v1386_v1  ;;  %s1079_s19 = sphi %s1077_s19, %s321_s19   ;;  %v1075_v3 = vphi %v1073_v3, %v1074_v3  }
  0xb1   : >> { %s326_s2 = sld [smem:[#allocation6 + %s1079_s19]] }
  0xb2   : >> { %s327_s3 = sld [smem:[#allocation5 + %s1079_s19]]  ;;  %s321_s19 = sadd.s32 1, %s1079_s19  }
  0xb3   : >> { %p320_p4 = scmp.ge.s32.totalorder %s321_s19, %s1380_s30 }
  0xb6   : >> { %s328_s12 = scalar_lea.vmem %s274_s16, %s325_s1 [#allocation8] }
  0xb7   : >> { %s330_s13 = scalar_lea.vmem %s1493_s6, %s326_s2  ;;  %v329_v5 = vld [vmem:[%s328_s12] sm:$0x1] }
  0xb8   : >> { %v331_v6 = vld [vmem:[%s330_s13] sm:$0x1]  ;;  %s333_s29 = ssub.s32 %s327_s3, %s1375_s10 }
  0xb9   : >> { %v332_v7 = vmul.f32 %v331_v6, %v329_v5  ;;  %v334_v8 = vstv %s333_s29 }
  0xba   : >> { %vm335_vm0 = vcmp.eq.s32.totalorder %v1386_v1, %v334_v8  ;;  %323 = sbr.rel (!%p320_p4) target bundleno = 176 (0xb0), region = 101 }
  0xbb   : >> { %v341_v9 = vrot.slane %v332_v7, %v340_v4 }
  0xbd   : >> { %v342_v10 = vsel %vm335_vm0, %v341_v9, 0.0 }
  0xbe   : >> { %v343_v11 = vadd.f32 %v1075_v3, %v342_v10  }
  0xc0   : >> { %v1074_v3 = vmov %v343_v11   ;;  %v1082_v2 = vmov (%p320_p4), %v343_v11  }
  0xc1 PF: > { %v807_v12 = vld [vmem:[#allocation11] sm:$0xff]   ;;  %v1096_v13 = vmov 0.0   ;;  %v808_v14 = vld [vmem:[#allocation11 + $0x8] sm:$0xff]   ;;  %vm1097_vm1 = vmmov 0   ;;  %s344_s13 = sld [smem:[#allocation7 + %s1059_s25]]  ;;  %v809_v15 = vld [vmem:[#allocation11 + $0x10] sm:$0xff]   ;;  %v1083_v2 = vphi %v1081_v2, %v1082_v2  }
  0xc2   : > { %639 = vmatprep.subr.bf16.mxu0 %v1096_v13  ;;  %655 = vmatprep.mubr.msk.bf16.mxu0 %vm1097_vm1, %v1096_v13  ;;  %v810_v16 = vld [vmem:[#allocation11 + $0x18] sm:$0xff]   ;;  %v811_v17 = vld [vmem:[#allocation11 + $0x20] sm:$0xff]   ;;  %v812_v19 = vld [vmem:[#allocation11 + $0x28] sm:$0xff]   ;;  %s1537_s0 = sld [smem:[#allocation20_spill]]  ;;  %s489_s3 = sshll.u32 %s307_s21, 4  ;;  %s1427_s3 = int_to_ptr.vmem [resolvable:$true] %s489_s3 }
  0xc3   : > { %640 = vmatpush3.bf16.msra.mxu0 %v807_v12  ;;  %v614_v20 = vld [vmem:[%s310_s18] ss:$0 sm:$0xff]  ;;  %v814_v24 = vld [vmem:[#allocation11 + $0x38] sm:$0xff]   ;;  %s1538_s17 = sld [smem:[#allocation25_spill]] }
  0xc4   : > { %641 = vmatprep.subr.bf16.mxu0 %v1096_v13  ;;  %v813_v21 = vld [vmem:[#allocation11 + $0x30] sm:$0xff]  }
  0xc5   : > { %v615_v26 = vld [vmem:[%s1496_s9] ss:$0 sm:$0xff] }
  0xc7   : > { %642 = vmatpush3.bf16.msra.mxu0 %v808_v14  ;;  %s345_s15 = ssub.s32 %s344_s13, %s1375_s10  ;;  %s625_s10 = sshll.u32 %s1059_s25, 1 }
  0xc8   : > { %643 = vmatprep.subr.bf16.mxu0 %v1096_v13  ;;  %v346_v18 = vstv %s345_s15  ;;  %s485_s19 = sadd.s32 %s1055_s24, %s625_s10  ;;  %s1539_s24 = sand.u32 1, %s1035_s4  }
  0xc9   : > { %vm347_vm2 = vcmp.eq.s32.totalorder %v1386_v1, %v346_v18  ;;  %s626_s18 = sshll.u32 %s485_s19, 7  ;;  %s474_s25 = scalar_lea.sflag [#allocation10], %s1539_s24 }
  0xca   : > { %v357_v22 = vsel %vm347_vm2, %v614_v20, 0.0  ;;  %s1425_s29 = scalar_lea.hbm %s1538_s17, %s626_s18  ;;  %s931_s13 = scalar_lea.vmem %s1427_s3, 128 }
  0xcb   : > { %644 = vmatpush3.bf16.msra.mxu0 %v809_v15  ;;  %v358_v23 = vadd.f32 %v1083_v2, %v357_v22  ;;  %p932_p6 = scmp.ne.s32.totalorder %s1427_s3, %s931_s13  ;;  %p1540_p8 = scmp.ne.s32.totalorder %s1537_s0, 0 }
  0xcc   : > { %645 = vmatprep.subr.bf16.mxu0 %v1096_v13  ;;  %s1098_s15 = smov [#allocation13]  }
  0xcd   : > { %v359_v25 = vpack.c.bf16 %v358_v23, %v358_v23  ;;  %p933_p9 = pnand %p932_p6, %p1540_p8  ;;  %s935_s16 = sshll.u32 %s1098_s15, 4  ;;  %s936_s16 = int_to_ptr.vmem [resolvable:$false] %s935_s16 }
  0xce   : > { %s937_s30 = scalar_lea.vmem %s936_s16, 256  ;;  %p938_p0 = scmp.lt.s32.totalorder %s1427_s3, %s936_s16 }
  0xcf   : > { %646 = vmatpush3.bf16.msra.mxu0 %v810_v16  ;;  %p934_p11 = pneg %p933_p9  ;;  %p939_p3 = scmp.lt.s32.totalorder %s937_s30, %s931_s13 }
  0xd0   : > { %647 = vmatprep.subr.bf16.mxu0 %v1096_v13 }
  0xd1   : > { %p940_p7 = por %p939_p3, %p938_p0 }
  0xd3   : > { %648 = vmatpush3.bf16.msra.mxu0 %v811_v17  ;;  %p941_p10 = pnand %p940_p7, %p934_p11 }
  0xd4   : > { %649 = vmatprep.subr.bf16.mxu0 %v1096_v13 }
  0xd7   : > { %650 = vmatpush3.bf16.msra.mxu0 %v812_v19 }
  0xd8   : > { %651 = vmatprep.subr.bf16.mxu0 %v1096_v13 }
  0xdb   : > { %652 = vmatpush3.bf16.msra.mxu0 %v813_v21 }
  0xdc   : > { %653 = vmatprep.subr.bf16.mxu0 %v1096_v13 }
  0xdf   : > { %654 = vmatpush3.bf16.msra.mxu0 %v814_v24 }
  0xe2   : > { %656 = vmatmul.mubr.bf16.vlgmr.msra.gmra.mrb[0].mxu0 %v359_v25 }
 0x1b5   : > { %v465_v27 = vpop.f32.mrb[0].mxu0 }
 0x1b6   : > { %v466_v28 = vadd.f32 %v615_v26, %v465_v27  ;;  %v657_v29 = vpop.f32.mrb[1].mxu0 }
 0x1b7   : > { %v468_v30 = vpop.f32.mrb[2].mxu0 }
 0x1b8   : > { %v471_v31 = vmax.f32 %v466_v28, 0.0  ;;  %v658_v32 = vpop.f32.mrb[3].mxu0 }
 0x1ba   : > { %472 = vst [vmem:[%s307_s21] sm:$0xff] %v471_v31 }
 0x1bb   : > { %944 = shalt.err (!%p941_p10)
}
 0x1bc   : > { %s945_s11 = scalar_lea.hbm %s1425_s29, 128  ;;  %s949_s19 = scalar_lea.hbm %s1538_s17, 512 }
 0x1bd   : > { %p946_p1 = scmp.ne.s32.totalorder %s1425_s29, %s945_s11  ;;  %p950_p13 = scmp.lt.u32.totalorder %s1425_s29, %s1538_s17 }
 0x1be   : > { %p951_p2 = scmp.lt.u32.totalorder %s949_s19, %s945_s11  ;;  %p953_p6 = scmp.lt.u32.totalorder %s945_s11, %s1425_s29 }
 0x1bf   : > { %p947_p5 = pnand %p946_p1, %p1540_p8 }
 0x1c0   : > { %p952_p4 = por %p951_p2, %p950_p13 }
 0x1c1   : > { %p948_p12 = pneg %p947_p5 }
 0x1c2   : > { %p954_p9 = por %p953_p6, %p952_p4 }
 0x1c4   : > { %p955_p11 = pnand %p954_p9, %p948_p12 }
 0x1c6   : > { %958 = shalt.err (!%p955_p11)
}
 0x1c7   : > { %665 = dma.vmem_to_hbm [thread:$0]  (%p1540_p8), %s1427_s3, 128, %s1425_s29, %s474_s25  }
 0x1c8 PF: > { %s1541_s18 = sld [smem:[#allocation18_spill]]  ;;  %s1542_s12 = sld [smem:[#allocation21_spill]] }
 0x1c9   : > { %p682_p0 = scmp.ge.s32.totalorder %s1071_s28, 2 }
 0x1ce   : > { %s501_s14 = sand.u32 1, %s1541_s18   ;;  %p1543_p3 = scmp.ne.s32.totalorder %s1542_s12, 0 }
 0x1cf   : > { %s502_s24 = scalar_lea.sflag [#allocation10], %s501_s14 }
 0x1d0   : > { %p676_p7 = pnand %p682_p0, %p1543_p3 }
 0x1d2   : > { %1026 = dma.done.wait (!%p676_p7), %s502_s24, 128  }
 0x1d3   : > { %1028 = vsyncadd (!%p676_p7), %s502_s24, 4294967168  ;;  %s47_s28 = sadd.s32 1, %s1071_s28   ;;  %s1544_s24 = sld [smem:[#allocation19_spill]] }
 0x1d4   : > { %p44_p10 = scmp.ge.s32.totalorder %s47_s28, 6   ;;  %s1545_s0 = sld [smem:[#allocation22_spill]] }
 0x1d5   : > { %s1546_s3 = sld [smem:[#allocation23_spill]]  ;;  %s1547_s19 = smov %s1035_s4 }
 0x1d6   : > { %s1548_s4 = smov %s1039_s20  ;;  %s1549_s20 = smov %s1315_s26 }
 0x1d7   : > { %s1550_s21 = smov %s1047_s22  ;;  %s1551_s22 = smov %s1051_s23 }
 0x1d8   : > { %s1552_s23 = smov %s1310_s8  ;;  %s1553_s25 = smov %s1067_s27 }
 0x1d9   :  { %46 = sbr.rel (!%p44_p10) target bundleno = 64 (0x40), region = 112 }
 0x1da   : > { %s1554_s26 = smov %s1545_s0 }
 0x1db   : > { %s1555_s27 = smov %s1546_s3 }
 0x1e0   :  { %507 = vsyncpa [#allocation9], 1 }
 0x1e1   :  { %509 = vsyncpa [#allocation9 + $0x1], 1 }
 0x1e2   :  { %510 = vsyncpa [#allocation12], 1 }
 0x1e3   :  { %511 = vsyncpa [#allocation10], 1 }
 0x1e4   :  { %513 = vsyncpa [#allocation10 + $0x1], 1 }

</bundles_post_ra>
